<compile_context>
chip_gen: v7x
topology: tpu7x:2x2x1
jax: 0.10.0
libtpu: 0.0.40
codegen_flags: <defaults>
</compile_context>

<pallas_src>
import jax
import jax.numpy as jnp
from jax import lax
from jax.experimental import pallas as pl
from jax.experimental.pallas import tpu as pltpu


def _make_self_attention_kernel(emit_scores):
    def kernel(
        x_ref,       # (T, D)   full sequence rows (for the K/V projection), cdt
        xq_ref,      # (TQ, D)  this program's query rows, cdt
        wq_ref,      # (D, D)   cdt, pre-scaled by 1/sqrt(D)
        wk_ref,      # (D, D)   cdt
        wv_ref,      # (D, D)   cdt
        wo_ref,      # (D, D)   cdt
        bq_ref,      # (1, D)   f32, pre-scaled by 1/sqrt(D)
        bk_ref,      # (1, D)   f32
        bv_ref,      # (1, D)   f32
        bo_ref,      # (1, D)   f32
        *refs,       # out_ref (TQ, D), [scores_ref (TQ, T)], k_scr (T, D), v_scr (T, D)
    ):
        if emit_scores:
            out_ref, scores_ref, k_scr, v_scr = refs
        else:
            out_ref, k_scr, v_scr = refs
            scores_ref = None

        cdt = k_scr.dtype  # MXU operand dtype (bf16 by default)

        # K/V projection once per batch: only on the first query tile of this
        # batch's inner loop.  Results persist in VMEM scratch across query tiles.
        @pl.when(pl.program_id(1) == 0)
        def _():
            x_full = x_ref[...]
            k = jnp.dot(x_full, wk_ref[...],
                        preferred_element_type=jnp.float32) + bk_ref[...]
            v = jnp.dot(x_full, wv_ref[...],
                        preferred_element_type=jnp.float32) + bv_ref[...]
            k_scr[...] = k.astype(cdt)
            v_scr[...] = v.astype(cdt)

        # Q projection for this tile only (1/sqrt(D) already folded into wq/bq).
        q = jnp.dot(xq_ref[...], wq_ref[...],
                    preferred_element_type=jnp.float32) + bq_ref[...]

        # Scaled attention scores: bf16 operands on the MXU, f32 accumulation.
        # Contract last dims directly (no k.T materialized).
        scores = lax.dot_general(
            q.astype(cdt), k_scr[...], (((1,), (1,)), ((), ())),
            preferred_element_type=jnp.float32)
        if emit_scores:
            scores_ref[...] = scores.astype(scores_ref.dtype)

        # Numerically-stable softmax over the full key axis (present in this block).
        m = jnp.max(scores, axis=-1, keepdims=True)
        e = jnp.exp(scores - m)
        denom = jnp.sum(e, axis=-1, keepdims=True)
        # EUP slot; approximate reciprocal (not bit-exact vs torch.softmax).
        weights = e * pl.reciprocal(denom, approx=True)

        # TODO(synk): dropout on attn_weights omitted (eval-mode identity); mask=None only.

        attn = jnp.dot(weights.astype(cdt), v_scr[...],
                       preferred_element_type=jnp.float32)          # (TQ, D) f32

        out = jnp.dot(attn.astype(wo_ref.dtype), wo_ref[...],
                      preferred_element_type=jnp.float32) + bo_ref[...]
        out_ref[...] = out.astype(out_ref.dtype)

    return kernel


def _vmem_limit_bytes(default=48 * 1024 * 1024):
    """~75% of this chip's physical VMEM (96 MiB on v5e/v6e, 48 MiB on v7x)."""
    try:
        info = pltpu.get_tpu_info()
        cap = getattr(info, "vmem_capacity_bytes", None)
        if cap:
            return int(cap) * 3 // 4
    except Exception:
        pass
    return default


def _choose_query_tile(T, *, max_tile=512, multiple=16):
    """Largest query tile <= max_tile that is a multiple of `multiple` and
    (preferably) divides T.  Never silently falls back to a full-T tile for
    large T; a ragged last tile is handled by a cdiv grid + masked writes."""
    max_tile = max(multiple, (max_tile // multiple) * multiple)
    if T <= max_tile:
        return T
    for cand in range(max_tile, multiple - 1, -multiple):
        if T % cand == 0:
            return cand
    for cand in range(max_tile, 7, -8):      # relax to multiple-of-8 divisors
        if T % cand == 0:
            return cand
    return max_tile                           # ragged; grid uses pl.cdiv


def _estimate_vmem_bytes(T, D, TQ, cdt_bytes, score_bytes, emit_scores):
    """Rough per-step live-VMEM estimate (double-buffered inputs/outputs +
    persistent K/V scratch + f32 softmax temporaries)."""
    weights = 2 * 4 * D * D * cdt_bytes + 4 * D * 4
    x_full = 2 * T * D * cdt_bytes
    xq = 2 * TQ * D * cdt_bytes
    kv_scratch = 2 * T * D * cdt_bytes
    out = 2 * TQ * D * 4
    scores_out = (2 * TQ * T * score_bytes) if emit_scores else 0
    temps = 3 * TQ * T * 4 + 2 * TQ * D * 4
    return weights + x_full + xq + kv_scratch + out + scores_out + temps


def self_attention(x, params, *, compute_dtype=jnp.bfloat16,
                   return_scores=True, scores_dtype=jnp.float32):
    """x: (B, T, D). params: dict of PyTorch-convention Linear weights/biases.

    Returns (out, attn_scores) matching SelfAttention.forward(x, mask=None) in
    eval mode (or just `out` if return_scores=False).  `compute_dtype` (default
    bf16) is the MXU operand dtype for x / weights / the attention matmuls;
    accumulation and the softmax stay float32.  Use compute_dtype=jnp.float32
    for bit-closer parity with the float32 PyTorch reference.
    """
    B, T, D = x.shape
    cdt = jnp.dtype(compute_dtype)
    f32 = jnp.float32
    scale = 1.0 / jnp.sqrt(jnp.float32(D))

    # PyTorch Linear stores W as (out, in); pre-transpose so the kernel does x @ W.
    # Fold the 1/sqrt(D) score scale into the Q projection (exact in real math).
    wq = (params["wq"].T * scale).astype(cdt)     # (D, D)
    wk = params["wk"].T.astype(cdt)               # (D, D)
    wv = params["wv"].T.astype(cdt)               # (D, D)
    wo = params["wo"].T.astype(cdt)               # (D, D)
    bq = (params["bq"] * scale).reshape(1, D).astype(f32)
    bk = params["bk"].reshape(1, D).astype(f32)
    bv = params["bv"].reshape(1, D).astype(f32)
    bo = params["bo"].reshape(1, D).astype(f32)
    xc = x.astype(cdt)

    cdt_bytes = cdt.itemsize
    score_bytes = jnp.dtype(scores_dtype).itemsize
    vmem_limit = _vmem_limit_bytes()
    tile_multiple = 16 if cdt_bytes < 4 else 8

    TQ = _choose_query_tile(T, max_tile=512, multiple=tile_multiple)
    # Shrink the query tile if the footprint would crowd this chip's VMEM (v7x).
    while TQ > 128 and _estimate_vmem_bytes(
            T, D, TQ, cdt_bytes, score_bytes, return_scores) > (vmem_limit * 3) // 4:
        TQ = _choose_query_tile(T, max_tile=TQ // 2, multiple=tile_multiple)
    num_q_tiles = pl.cdiv(T, TQ)

    # Advisory cost estimate (K/V projection now counted once per batch).
    cost = pl.CostEstimate(
        flops=B * (8 * T * D * D + 4 * T * T * D),
        transcendentals=B * T * T,
        bytes_accessed=(2 * B * T * D * cdt_bytes + 4 * D * D * cdt_bytes
                        + B * T * D * x.dtype.itemsize
                        + (B * T * T * score_bytes if return_scores else 0)),
    )

    full = lambda b, q: (0, 0)
    in_specs = [
        pl.BlockSpec((None, T, D), lambda b, q: (b, 0, 0)),    # x: full sequence (K/V)
        pl.BlockSpec((None, TQ, D), lambda b, q: (b, q, 0)),   # x: this query tile
        pl.BlockSpec((D, D), full),      # wq (pre-scaled)
        pl.BlockSpec((D, D), full),      # wk
        pl.BlockSpec((D, D), full),      # wv
        pl.BlockSpec((D, D), full),      # wo
        pl.BlockSpec((1, D), full),      # bq (pre-scaled)
        pl.BlockSpec((1, D), full),      # bk
        pl.BlockSpec((1, D), full),      # bv
        pl.BlockSpec((1, D), full),      # bo
    ]
    out_spec_out = pl.BlockSpec((None, TQ, D), lambda b, q: (b, q, 0))
    if return_scores:
        out_shape = (
            jax.ShapeDtypeStruct((B, T, D), x.dtype),
            jax.ShapeDtypeStruct((B, T, T), scores_dtype),
        )
        out_specs = [out_spec_out,
                     pl.BlockSpec((None, TQ, T), lambda b, q: (b, q, 0))]
    else:
        out_shape = jax.ShapeDtypeStruct((B, T, D), x.dtype)
        out_specs = out_spec_out

    result = pl.pallas_call(
        _make_self_attention_kernel(return_scores),
        out_shape=out_shape,
        grid_spec=pltpu.PrefetchScalarGridSpec(
            num_scalar_prefetch=0,
            grid=(B, num_q_tiles),
            in_specs=in_specs,
            out_specs=out_specs,
            scratch_shapes=[
                pltpu.VMEM((T, D), cdt),   # K cache (persists across query tiles)
                pltpu.VMEM((T, D), cdt),   # V cache
            ],
        ),
        compiler_params=pltpu.CompilerParams(
            # Batch axis is independent (megacore shardable); the query-tile axis
            # carries the persistent K/V scratch, so it must be sequential.
            dimension_semantics=("parallel", "arbitrary"),
            vmem_limit_bytes=vmem_limit,
        ),
        cost_estimate=cost,
    )(xc, xc, wq, wk, wv, wo, bq, bk, bv, bo)
    return result


def _reference(x, params):
    """Plain-JAX reference mirroring the PyTorch forward (mask=None, eval)."""
    B, T, D = x.shape
    q = x @ params["wq"].T + params["bq"]
    k = x @ params["wk"].T + params["bk"]
    v = x @ params["wv"].T + params["bv"]
    scores = jnp.einsum("btd,bsd->bts", q, k) / jnp.sqrt(jnp.float32(D))
    w = jax.nn.softmax(scores, axis=-1)
    attn = jnp.einsum("bts,bsd->btd", w, v)
    out = attn @ params["wo"].T + params["bo"]
    return out, scores


if __name__ == "__main__":
    B, T, D = 2, 8, 32
    key = jax.random.PRNGKey(0)
    k_x, k_wq, k_wk, k_wv, k_wo, k_bq, k_bk, k_bv, k_bo = jax.random.split(key, 9)

    x = jax.random.normal(k_x, (B, T, D), dtype=jnp.float32)
    scale = 1.0 / jnp.sqrt(jnp.float32(D))
    params = {
        "wq": jax.random.normal(k_wq, (D, D), jnp.float32) * scale,
        "wk": jax.random.normal(k_wk, (D, D), jnp.float32) * scale,
        "wv": jax.random.normal(k_wv, (D, D), jnp.float32) * scale,
        "wo": jax.random.normal(k_wo, (D, D), jnp.float32) * scale,
        "bq": jax.random.normal(k_bq, (D,), jnp.float32) * 0.01,
        "bk": jax.random.normal(k_bk, (D,), jnp.float32) * 0.01,
        "bv": jax.random.normal(k_bv, (D,), jnp.float32) * 0.01,
        "bo": jax.random.normal(k_bo, (D,), jnp.float32) * 0.01,
    }

    ref_out, ref_scores = _reference(x, params)

    # 1) f32 compute path: tight parity with the PyTorch-style reference.
    out32, scores32 = self_attention(x, params, compute_dtype=jnp.float32)
    out32, scores32 = jax.block_until_ready((out32, scores32))
    assert out32.shape == (B, T, D) and scores32.shape == (B, T, T)
    assert jnp.allclose(scores32, ref_scores, atol=1e-4, rtol=1e-4)
    # Output tolerance covers the EUP approximate reciprocal in the softmax.
    assert jnp.allclose(out32, ref_out, atol=2e-3, rtol=2e-3)

    # 2) Default bf16-MXU path: looser tolerance from bf16 operand rounding.
    out_bf, scores_bf = self_attention(x, params)
    out_bf, scores_bf = jax.block_until_ready((out_bf, scores_bf))
    assert jnp.allclose(scores_bf, ref_scores, atol=5e-2, rtol=5e-2)
    assert jnp.allclose(out_bf, ref_out, atol=5e-2, rtol=5e-2)

    # 3) No-scores variant (skips the (B,T,T) HBM writeback entirely).
    out_only = jax.block_until_ready(
        self_attention(x, params, return_scores=False))
    assert out_only.shape == (B, T, D)
    assert jnp.allclose(out_only, ref_out, atol=5e-2, rtol=5e-2)

    print("KERNEL_OK")
</pallas_src>

<mosaic_0001>
module attributes {stable_mosaic.version = 11 : i64} {
  func.func @kernel(%arg0: i32, %arg1: i32, %arg2: memref<1x8x32xf32, #tpu.memory_space<vmem>>, %arg3: memref<1x8x32xf32, #tpu.memory_space<vmem>>, %arg4: memref<32x32xf32, #tpu.memory_space<vmem>>, %arg5: memref<32x32xf32, #tpu.memory_space<vmem>>, %arg6: memref<32x32xf32, #tpu.memory_space<vmem>>, %arg7: memref<32x32xf32, #tpu.memory_space<vmem>>, %arg8: memref<1x32xf32, #tpu.memory_space<vmem>>, %arg9: memref<1x32xf32, #tpu.memory_space<vmem>>, %arg10: memref<1x32xf32, #tpu.memory_space<vmem>>, %arg11: memref<1x32xf32, #tpu.memory_space<vmem>>, %arg12: memref<1x8x32xf32, #tpu.memory_space<vmem>>, %arg13: memref<1x8x8xf32, #tpu.memory_space<vmem>>, %arg14: memref<8x32xf32, #tpu.memory_space<vmem>>, %arg15: memref<8x32xf32, #tpu.memory_space<vmem>>) attributes {dimension_semantics = [#tpu.dimension_semantics<parallel>, #tpu.dimension_semantics<arbitrary>], iteration_bounds = array<i64: 2, 1>, scalar_prefetch = 0 : i64, scratch_operands = 2 : i64, tpu.core_type = #tpu.core_type<tc>, window_params = [{transform_indices = @transform_0, window_bounds = array<i64: 1, 8, 32>}, {transform_indices = @transform_1, window_bounds = array<i64: 1, 8, 32>}, {pipeline_mode = #tpu.pipeline_mode<synchronous>, transform_indices = @transform_2, window_bounds = array<i64: 32, 32>}, {pipeline_mode = #tpu.pipeline_mode<synchronous>, transform_indices = @transform_3, window_bounds = array<i64: 32, 32>}, {pipeline_mode = #tpu.pipeline_mode<synchronous>, transform_indices = @transform_4, window_bounds = array<i64: 32, 32>}, {pipeline_mode = #tpu.pipeline_mode<synchronous>, transform_indices = @transform_5, window_bounds = array<i64: 32, 32>}, {pipeline_mode = #tpu.pipeline_mode<synchronous>, transform_indices = @transform_6, window_bounds = array<i64: 1, 32>}, {pipeline_mode = #tpu.pipeline_mode<synchronous>, transform_indices = @transform_7, window_bounds = array<i64: 1, 32>}, {pipeline_mode = #tpu.pipeline_mode<synchronous>, transform_indices = @transform_8, window_bounds = array<i64: 1, 32>}, {pipeline_mode = #tpu.pipeline_mode<synchronous>, transform_indices = @transform_9, window_bounds = array<i64: 1, 32>}, {transform_indices = @transform_10, window_bounds = array<i64: 1, 8, 32>}, {transform_indices = @transform_11, window_bounds = array<i64: 1, 8, 8>}]} {
    %c0_i32 = arith.constant 0 : i32
    %0 = arith.cmpi eq, %arg1, %c0_i32 : i32
    %1 = arith.extui %0 : i1 to i32
    %c0_i32_0 = arith.constant 0 : i32
    %2 = arith.cmpi ne, %1, %c0_i32_0 : i32
    scf.if %2 {
      %c0_26 = arith.constant 0 : index
      %c0_27 = arith.constant 0 : index
      %c0_28 = arith.constant 0 : index
      %35 = vector.load %arg2[%c0_26, %c0_27, %c0_28] : memref<1x8x32xf32, #tpu.memory_space<vmem>>, vector<1x8x32xf32>
      %36 = vector.shape_cast %35 : vector<1x8x32xf32> to vector<8x32xf32>
      %c0_29 = arith.constant 0 : index
      %c0_30 = arith.constant 0 : index
      %37 = vector.load %arg5[%c0_29, %c0_30] : memref<32x32xf32, #tpu.memory_space<vmem>>, vector<32x32xf32>
      %cst_31 = arith.constant dense<0.000000e+00> : vector<8x32xf32>
      %38 = tpu.matmul %36, %37, %cst_31 {dimension_numbers = #tpu.dot_dimension_numbers<[1], [0], [0], [1], [0, 0, 1, 1], [], []>} : vector<8x32xf32>, vector<32x32xf32>, vector<8x32xf32> -> vector<8x32xf32>
      %c0_32 = arith.constant 0 : index
      %c0_33 = arith.constant 0 : index
      %39 = vector.load %arg9[%c0_32, %c0_33] : memref<1x32xf32, #tpu.memory_space<vmem>>, vector<1x32xf32>
      %40 = vector.broadcast %39 : vector<1x32xf32> to vector<8x32xf32>
      %41 = arith.addf %38, %40 : vector<8x32xf32>
      %c0_34 = arith.constant 0 : index
      %c0_35 = arith.constant 0 : index
      %42 = vector.load %arg6[%c0_34, %c0_35] : memref<32x32xf32, #tpu.memory_space<vmem>>, vector<32x32xf32>
      %cst_36 = arith.constant dense<0.000000e+00> : vector<8x32xf32>
      %43 = tpu.matmul %36, %42, %cst_36 {dimension_numbers = #tpu.dot_dimension_numbers<[1], [0], [0], [1], [0, 0, 1, 1], [], []>} : vector<8x32xf32>, vector<32x32xf32>, vector<8x32xf32> -> vector<8x32xf32>
      %c0_37 = arith.constant 0 : index
      %c0_38 = arith.constant 0 : index
      %44 = vector.load %arg10[%c0_37, %c0_38] : memref<1x32xf32, #tpu.memory_space<vmem>>, vector<1x32xf32>
      %45 = vector.broadcast %44 : vector<1x32xf32> to vector<8x32xf32>
      %46 = arith.addf %43, %45 : vector<8x32xf32>
      %c0_39 = arith.constant 0 : index
      %c0_40 = arith.constant 0 : index
      %47 = vector.load %arg14[%c0_39, %c0_40] : memref<8x32xf32, #tpu.memory_space<vmem>>, vector<8x32xf32>
      tpu.vector_store %arg14[%c0_39, %c0_40], %41 {strides = array<i32>} : memref<8x32xf32, #tpu.memory_space<vmem>>, vector<8x32xf32>,
      %c0_41 = arith.constant 0 : index
      %c0_42 = arith.constant 0 : index
      %48 = vector.load %arg15[%c0_41, %c0_42] : memref<8x32xf32, #tpu.memory_space<vmem>>, vector<8x32xf32>
      tpu.vector_store %arg15[%c0_41, %c0_42], %46 {strides = array<i32>} : memref<8x32xf32, #tpu.memory_space<vmem>>, vector<8x32xf32>,
    } else {
    }
    %c0 = arith.constant 0 : index
    %c0_1 = arith.constant 0 : index
    %c0_2 = arith.constant 0 : index
    %3 = vector.load %arg3[%c0, %c0_1, %c0_2] : memref<1x8x32xf32, #tpu.memory_space<vmem>>, vector<1x8x32xf32>
    %4 = vector.shape_cast %3 : vector<1x8x32xf32> to vector<8x32xf32>
    %c0_3 = arith.constant 0 : index
    %c0_4 = arith.constant 0 : index
    %5 = vector.load %arg4[%c0_3, %c0_4] : memref<32x32xf32, #tpu.memory_space<vmem>>, vector<32x32xf32>
    %cst = arith.constant dense<0.000000e+00> : vector<8x32xf32>
    %6 = tpu.matmul %4, %5, %cst {dimension_numbers = #tpu.dot_dimension_numbers<[1], [0], [0], [1], [0, 0, 1, 1], [], []>} : vector<8x32xf32>, vector<32x32xf32>, vector<8x32xf32> -> vector<8x32xf32>
    %c0_5 = arith.constant 0 : index
    %c0_6 = arith.constant 0 : index
    %7 = vector.load %arg8[%c0_5, %c0_6] : memref<1x32xf32, #tpu.memory_space<vmem>>, vector<1x32xf32>
    %8 = vector.broadcast %7 : vector<1x32xf32> to vector<8x32xf32>
    %9 = arith.addf %6, %8 : vector<8x32xf32>
    %c0_7 = arith.constant 0 : index
    %c0_8 = arith.constant 0 : index
    %10 = vector.load %arg14[%c0_7, %c0_8] : memref<8x32xf32, #tpu.memory_space<vmem>>, vector<8x32xf32>
    %cst_9 = arith.constant dense<0.000000e+00> : vector<8x8xf32>
    %11 = tpu.matmul %9, %10, %cst_9 {dimension_numbers = #tpu.dot_dimension_numbers<[1], [1], [0], [0], [0, 0, 1, 0], [], []>} : vector<8x32xf32>, vector<8x32xf32>, vector<8x8xf32> -> vector<8x8xf32>
    %c0_10 = arith.constant 0 : index
    %c0_11 = arith.constant 0 : index
    %c0_12 = arith.constant 0 : index
    %12 = vector.load %arg13[%c0_10, %c0_11, %c0_12] : memref<1x8x8xf32, #tpu.memory_space<vmem>>, vector<1x8x8xf32>
    %13 = vector.shape_cast %12 : vector<1x8x8xf32> to vector<8x8xf32>
    %14 = vector.shape_cast %11 : vector<8x8xf32> to vector<1x8x8xf32>
    tpu.vector_store %arg13[%c0_10, %c0_11, %c0_12], %14 {strides = array<i32>} : memref<1x8x8xf32, #tpu.memory_space<vmem>>, vector<1x8x8xf32>,
    %cst_13 = arith.constant dense<0xFF800000> : vector<8xf32>
    %15 = vector.multi_reduction <maximumf>, %11, %cst_13 [1] : vector<8x8xf32> to vector<8xf32>
    %16 = vector.shape_cast %15 : vector<8xf32> to vector<8x1xf32>
    %17 = vector.broadcast %16 : vector<8x1xf32> to vector<8x8xf32>
    %18 = arith.subf %11, %17 : vector<8x8xf32>
    %19 = math.exp %18 : vector<8x8xf32>
    %cst_14 = arith.constant dense<0.000000e+00> : vector<8xf32>
    %20 = vector.multi_reduction <add>, %19, %cst_14 [1] : vector<8x8xf32> to vector<8xf32>
    %21 = vector.shape_cast %20 : vector<8xf32> to vector<8x1xf32>
    %22 = tpu.reciprocal %21 {approx = true} : vector<8x1xf32> -> vector<8x1xf32>
    %23 = vector.broadcast %22 : vector<8x1xf32> to vector<8x8xf32>
    %24 = arith.mulf %19, %23 : vector<8x8xf32>
    %c0_15 = arith.constant 0 : index
    %c0_16 = arith.constant 0 : index
    %25 = vector.load %arg15[%c0_15, %c0_16] : memref<8x32xf32, #tpu.memory_space<vmem>>, vector<8x32xf32>
    %cst_17 = arith.constant dense<0.000000e+00> : vector<8x32xf32>
    %26 = tpu.matmul %24, %25, %cst_17 {dimension_numbers = #tpu.dot_dimension_numbers<[1], [0], [0], [1], [0, 0, 1, 1], [], []>} : vector<8x8xf32>, vector<8x32xf32>, vector<8x32xf32> -> vector<8x32xf32>
    %c0_18 = arith.constant 0 : index
    %c0_19 = arith.constant 0 : index
    %27 = vector.load %arg7[%c0_18, %c0_19] : memref<32x32xf32, #tpu.memory_space<vmem>>, vector<32x32xf32>
    %cst_20 = arith.constant dense<0.000000e+00> : vector<8x32xf32>
    %28 = tpu.matmul %26, %27, %cst_20 {dimension_numbers = #tpu.dot_dimension_numbers<[1], [0], [0], [1], [0, 0, 1, 1], [], []>} : vector<8x32xf32>, vector<32x32xf32>, vector<8x32xf32> -> vector<8x32xf32>
    %c0_21 = arith.constant 0 : index
    %c0_22 = arith.constant 0 : index
    %29 = vector.load %arg11[%c0_21, %c0_22] : memref<1x32xf32, #tpu.memory_space<vmem>>, vector<1x32xf32>
    %30 = vector.broadcast %29 : vector<1x32xf32> to vector<8x32xf32>
    %31 = arith.addf %28, %30 : vector<8x32xf32>
    %c0_23 = arith.constant 0 : index
    %c0_24 = arith.constant 0 : index
    %c0_25 = arith.constant 0 : index
    %32 = vector.load %arg12[%c0_23, %c0_24, %c0_25] : memref<1x8x32xf32, #tpu.memory_space<vmem>>, vector<1x8x32xf32>
    %33 = vector.shape_cast %32 : vector<1x8x32xf32> to vector<8x32xf32>
    %34 = vector.shape_cast %31 : vector<8x32xf32> to vector<1x8x32xf32>
    tpu.vector_store %arg12[%c0_23, %c0_24, %c0_25], %34 {strides = array<i32>} : memref<1x8x32xf32, #tpu.memory_space<vmem>>, vector<1x8x32xf32>,
    return
  }
  func.func @transform_0(%arg0: i32, %arg1: i32) -> (i32, i32, i32) {
    %c0_i32 = arith.constant 0 : i32
    %c0_i32_0 = arith.constant 0 : i32
    %c0_i32_1 = arith.constant 0 : i32
    return %arg0, %c0_i32, %c0_i32_0 : i32, i32, i32
  }
  func.func @transform_1(%arg0: i32, %arg1: i32) -> (i32, i32, i32) {
    %c0_i32 = arith.constant 0 : i32
    %c0_i32_0 = arith.constant 0 : i32
    return %arg0, %arg1, %c0_i32 : i32, i32, i32
  }
  func.func @transform_2(%arg0: i32, %arg1: i32) -> (i32, i32) {
    %c0_i32 = arith.constant 0 : i32
    %c0_i32_0 = arith.constant 0 : i32
    %c0_i32_1 = arith.constant 0 : i32
    return %c0_i32, %c0_i32_0 : i32, i32
  }
  func.func @transform_3(%arg0: i32, %arg1: i32) -> (i32, i32) {
    %c0_i32 = arith.constant 0 : i32
    %c0_i32_0 = arith.constant 0 : i32
    %c0_i32_1 = arith.constant 0 : i32
    return %c0_i32, %c0_i32_0 : i32, i32
  }
  func.func @transform_4(%arg0: i32, %arg1: i32) -> (i32, i32) {
    %c0_i32 = arith.constant 0 : i32
    %c0_i32_0 = arith.constant 0 : i32
    %c0_i32_1 = arith.constant 0 : i32
    return %c0_i32, %c0_i32_0 : i32, i32
  }
  func.func @transform_5(%arg0: i32, %arg1: i32) -> (i32, i32) {
    %c0_i32 = arith.constant 0 : i32
    %c0_i32_0 = arith.constant 0 : i32
    %c0_i32_1 = arith.constant 0 : i32
    return %c0_i32, %c0_i32_0 : i32, i32
  }
  func.func @transform_6(%arg0: i32, %arg1: i32) -> (i32, i32) {
    %c0_i32 = arith.constant 0 : i32
    %c0_i32_0 = arith.constant 0 : i32
    %c0_i32_1 = arith.constant 0 : i32
    return %c0_i32, %c0_i32_0 : i32, i32
  }
  func.func @transform_7(%arg0: i32, %arg1: i32) -> (i32, i32) {
    %c0_i32 = arith.constant 0 : i32
    %c0_i32_0 = arith.constant 0 : i32
    %c0_i32_1 = arith.constant 0 : i32
    return %c0_i32, %c0_i32_0 : i32, i32
  }
  func.func @transform_8(%arg0: i32, %arg1: i32) -> (i32, i32) {
    %c0_i32 = arith.constant 0 : i32
    %c0_i32_0 = arith.constant 0 : i32
    %c0_i32_1 = arith.constant 0 : i32
    return %c0_i32, %c0_i32_0 : i32, i32
  }
  func.func @transform_9(%arg0: i32, %arg1: i32) -> (i32, i32) {
    %c0_i32 = arith.constant 0 : i32
    %c0_i32_0 = arith.constant 0 : i32
    %c0_i32_1 = arith.constant 0 : i32
    return %c0_i32, %c0_i32_0 : i32, i32
  }
  func.func @transform_10(%arg0: i32, %arg1: i32) -> (i32, i32, i32) {
    %c0_i32 = arith.constant 0 : i32
    %c0_i32_0 = arith.constant 0 : i32
    return %arg0, %arg1, %c0_i32 : i32, i32, i32
  }
  func.func @transform_11(%arg0: i32, %arg1: i32) -> (i32, i32, i32) {
    %c0_i32 = arith.constant 0 : i32
    %c0_i32_0 = arith.constant 0 : i32
    return %arg0, %arg1, %c0_i32 : i32, i32, i32
  }
}

</mosaic_0001>

<bundles_post_ra>
// kernel: tpu_custom_call.1
= control target key start
LH: loop header
LB: loop body
LE: loop exit
PB: predicated region body
PF: predicated region fallthrough
CT: control target
= control target key end

     0   :  { %s2303_s0 = inlined_call_operand.hbm [shape: f32[2,8,32], index: 0, kind: input, shape index: {}]   ;;  %s2304_s1 = inlined_call_operand.hbm [shape: f32[2,8,32], index: 1, kind: input, shape index: {}]   ;;  %s2305_s2 = inlined_call_operand.hbm [shape: f32[32,32], index: 2, kind: input, shape index: {}]   ;;  %s2306_s3 = inlined_call_operand.hbm [shape: f32[32,32], index: 3, kind: input, shape index: {}]   ;;  %s2307_s4 = inlined_call_operand.hbm [shape: f32[32,32], index: 4, kind: input, shape index: {}]   ;;  %s2308_s5 = inlined_call_operand.hbm [shape: f32[32,32], index: 5, kind: input, shape index: {}]   ;;  %s2309_s6 = inlined_call_operand.vmem [shape: f32[1,32], index: 6, kind: input, shape index: {}]   ;;  %s2310_s7 = inlined_call_operand.vmem [shape: f32[1,32], index: 7, kind: input, shape index: {}]   ;;  %s2311_s8 = inlined_call_operand.vmem [shape: f32[1,32], index: 8, kind: input, shape index: {}]   ;;  %s2312_s9 = inlined_call_operand.vmem [shape: f32[1,32], index: 9, kind: input, shape index: {}]   ;;  %s2313_s10 = inlined_call_operand.hbm [shape: f32[2,8,32], index: 10, kind: output, shape index: {0}]   ;;  %s2314_s11 = inlined_call_operand.hbm [shape: f32[2,8,8], index: 11, kind: output, shape index: {1}]  }
   0x1   :  { %2323 = sst [smem:[#allocation27_spill]] %s2305_s2 }
   0x2   :  { %2324 = sst [smem:[#allocation28_spill]] %s2306_s3 }
   0x3   :  { %2325 = sst [smem:[#allocation29_spill]] %s2307_s4 }
   0x4   :  { %2326 = sst [smem:[#allocation30_spill]] %s2308_s5 }
   0x5   :  { %2327 = sst [smem:[#allocation31_spill]] %s2311_s8 }
   0x6   :  { %2328 = sst [smem:[#allocation32_spill]] %s2312_s9 }
   0x7   :  { %2329 = sst [smem:[#allocation33_spill]] %s2313_s10 }
   0x8   :  { %2330 = sst [smem:[#allocation34_spill]] %s2314_s11 }
   0x9   :  { %17 = vsyncpa [#allocation5], 0 }
   0xa   :  { %19 = vsyncpa [#allocation5 + $0x1], 0 }
   0xb   :  { %20 = vsyncpa [#allocation8], 0 }
   0xc   :  { %22 = vsyncpa [#allocation8 + $0x1], 0 }
   0xd   :  { %23 = vsyncpa [#allocation11], 0 }
   0xe   :  { %24 = vsyncpa [#allocation14], 0 }
   0xf   :  { %25 = vsyncpa [#allocation6], 0 }
  0x10   :  { %27 = vsyncpa [#allocation6 + $0x1], 0 }
  0x11   :  { %28 = vsyncpa [#allocation17], 0 }
  0x12   :  { %30 = vsyncpa [#allocation17 + $0x1], 0  ;;  %s1882_s17 = smov 0   ;;  %s1884_s18 = smov 0  }
  0x13   :  { %s1886_s19 = smov 0   ;;  %s1888_s20 = smov 0  }
  0x14   :  { %s1890_s21 = smov 0   ;;  %s1892_s22 = smov 0  }
  0x15 LB: > { %2331 = sst [smem:[#allocation25_spill]] %s1799_s20  ;;  %s1913_s23 = sadd.s32 4294967295, %s1807_s22   ;;  %s1807_s22 = sphi %s1892_s22, %s36_s22   ;;  %s1803_s21 = sphi %s1890_s21, %s2368_s21   ;;  %s1799_s20 = sphi %s1888_s20, %s2367_s20   ;;  %s1795_s19 = sphi %s1886_s19, %s2366_s19   ;;  %s1791_s18 = sphi %s1884_s18, %s2365_s18   ;;  %s1787_s17 = sphi %s1882_s17, %s2364_s17  }
  0x16   : > { %p1245_p0 = scmp.ge.s32.totalorder %s1807_s22, 1  ;;  %p2318_p1 = scmp.eq.s32.totalorder %s1913_s23, 0 }
  0x17   : > { %p331_p2 = scmp.lt.s32.totalorder %s1807_s22, 3  ;;  %s1809_s25 = smov [#allocation9]  }
  0x18   : > { %s343_s26 = sshll.u32 %s1809_s25, 4  ;;  %s1810_s28 = smov [#allocation10]   ;;  %s1922_s26 = int_to_ptr.vmem [resolvable:$true] %s343_s26 }
  0x19   : > { %p1918_p3 = pnand %p1245_p0, %p331_p2  ;;  %s356_s29 = sshll.u32 %s1810_s28, 4  ;;  %s1933_s29 = int_to_ptr.vmem [resolvable:$true] %s356_s29 }
  0x1a   : > { %s1811_s30 = smov [#allocation12]   ;;  %s2334_s2 = sld [smem:[#allocation27_spill]] }
  0x1b   : > { %s2332_s24 = scalar_select %p1918_p3, 1, 0 }
  0x1c   : > { %p1407_p4 = pneg %p1918_p3  ;;  %s1935_s12 = sshll.u32 %s1811_s30, 4  ;;  %s370_s12 = int_to_ptr.vmem [resolvable:$true] %s1935_s12 }
  0x1e   : > { %p1929_p6 = pnand %p1407_p4, %p2318_p1 }
  0x20   : > { %s1505_s15 = scalar_lea.hbm %s2334_s2, 512  ;;  %p1945_p8 = pneg %p1929_p6 }
  0x21   : > { %p1506_p7 = scmp.ne.s32.totalorder %s2334_s2, %s1505_s15  ;;  %p1512_p11 = scmp.lt.u32.totalorder %s1505_s15, %s2334_s2 }
  0x23   : > { %p1508_p9 = pnand %p1945_p8, %p1506_p7 }
  0x25   : > { %p1509_p10 = pneg %p1508_p9 }
  0x27   : > { %p1514_p12 = pnand %p1512_p11, %p1509_p10 }
  0x29   : > { %1517 = shalt.err (!%p1514_p12)
}
  0x2a   : > { %s1518_s13 = scalar_lea.vmem %s1922_s26, 512  ;;  %p1526_p4 = scmp.lt.s32.totalorder %s1922_s26, %s1922_s26 }
  0x2b   : > { %p1519_p13 = scmp.ne.s32.totalorder %s1922_s26, %s1518_s13  ;;  %p1527_p5 = scmp.lt.s32.totalorder %s1518_s13, %s1518_s13 }
  0x2d   : > { %p1521_p0 = pnand %p1519_p13, %p1945_p8  ;;  %p1528_p7 = por %p1527_p5, %p1526_p4 }
  0x2f   : > { %p1522_p2 = pneg %p1521_p0 }
  0x31   : > { %p1529_p9 = pnand %p1528_p7, %p1522_p2 }
  0x33   : > { %1532 = shalt.err (!%p1529_p9)
}
  0x34   : > { %s1812_s14 = smov 128   ;;  %s1813_s15 = smov 8  }
  0x35   : > { %1410 = dma.hbm_to_vmem [thread:$0]  (!%p1929_p6), %s2334_s2, 512, %s1922_s26, [#allocation8], %s1812_s14, %s1812_s14, %s1813_s15  }
  0x36   : > { %s2336_s3 = sld [smem:[#allocation28_spill]] }
  0x3c   : > { %s1533_s13 = scalar_lea.hbm %s2336_s3, 512 }
  0x3d   : > { %p1534_p5 = scmp.ne.s32.totalorder %s2336_s3, %s1533_s13  ;;  %p1540_p12 = scmp.lt.u32.totalorder %s1533_s13, %s2336_s3 }
  0x3f   : > { %p1536_p10 = pnand %p1534_p5, %p1945_p8 }
  0x41   : > { %p1537_p11 = pneg %p1536_p10 }
  0x43   : > { %p1542_p13 = pnand %p1540_p12, %p1537_p11 }
  0x45   : > { %1545 = shalt.err (!%p1542_p13)
}
  0x46   : > { %s1546_s26 = scalar_lea.vmem %s1933_s29, 512  ;;  %p1554_p7 = scmp.lt.s32.totalorder %s1933_s29, %s1933_s29 }
  0x47   : > { %p1547_p0 = scmp.ne.s32.totalorder %s1933_s29, %s1546_s26  ;;  %p1555_p9 = scmp.lt.s32.totalorder %s1546_s26, %s1546_s26 }
  0x49   : > { %p1549_p2 = pnand %p1547_p0, %p1945_p8  ;;  %p1556_p5 = por %p1555_p9, %p1554_p7 }
  0x4b   : > { %p1550_p4 = pneg %p1549_p2 }
  0x4d   : > { %p1557_p10 = pnand %p1556_p5, %p1550_p4 }
  0x4f   : > { %1560 = shalt.err (!%p1557_p10)
}
  0x50   : > { %1413 = dma.hbm_to_vmem [thread:$0]  (!%p1929_p6), %s2336_s3, 512, %s1933_s29, [#allocation11], %s1812_s14, %s1812_s14, %s1813_s15  }
  0x51   : > { %s2337_s4 = sld [smem:[#allocation29_spill]] }
  0x57   : > { %s1561_s16 = scalar_lea.hbm %s2337_s4, 512 }
  0x58   : > { %p1562_p11 = scmp.ne.s32.totalorder %s2337_s4, %s1561_s16  ;;  %p1568_p0 = scmp.lt.u32.totalorder %s1561_s16, %s2337_s4 }
  0x5a   : > { %p1564_p12 = pnand %p1562_p11, %p1945_p8 }
  0x5c   : > { %p1565_p13 = pneg %p1564_p12 }
  0x5e   : > { %p1570_p2 = pnand %p1568_p0, %p1565_p13 }
  0x60   : > { %1573 = shalt.err (!%p1570_p2)
}
  0x61   : > { %s1574_s26 = scalar_lea.vmem %s370_s12, 512  ;;  %p1582_p5 = scmp.lt.s32.totalorder %s370_s12, %s370_s12 }
  0x62   : > { %p1575_p4 = scmp.ne.s32.totalorder %s370_s12, %s1574_s26  ;;  %p1583_p10 = scmp.lt.s32.totalorder %s1574_s26, %s1574_s26 }
  0x64   : > { %p1577_p7 = pnand %p1575_p4, %p1945_p8  ;;  %p1584_p1 = por %p1583_p10, %p1582_p5 }
  0x66   : > { %p1578_p9 = pneg %p1577_p7 }
  0x68   : > { %p1585_p3 = pnand %p1584_p1, %p1578_p9 }
  0x6a   : > { %1588 = shalt.err (!%p1585_p3)
}
  0x6b   : > { %1416 = dma.hbm_to_vmem [thread:$0]  (!%p1929_p6), %s2337_s4, 512, %s370_s12, [#allocation11], %s1812_s14, %s1812_s14, %s1813_s15  }
  0x6c   : > { %s1814_s9 = smov [#allocation13]   ;;  %s2338_s5 = sld [smem:[#allocation30_spill]] }
  0x6d   : > { %s382_s11 = sshll.u32 %s1814_s9, 4  ;;  %s383_s11 = int_to_ptr.vmem [resolvable:$true] %s382_s11 }
  0x72   : > { %s1589_s25 = scalar_lea.hbm %s2338_s5, 512 }
  0x73   : > { %p1590_p1 = scmp.ne.s32.totalorder %s2338_s5, %s1589_s25  ;;  %p1596_p12 = scmp.lt.u32.totalorder %s1589_s25, %s2338_s5 }
  0x75   : > { %p1592_p3 = pnand %p1590_p1, %p1945_p8 }
  0x77   : > { %p1593_p11 = pneg %p1592_p3 }
  0x79   : > { %p1598_p13 = pnand %p1596_p12, %p1593_p11 }
  0x7b   : > { %1601 = shalt.err (!%p1598_p13)
}
  0x7c   : > { %s1602_s12 = scalar_lea.vmem %s383_s11, 512  ;;  %p1610_p7 = scmp.lt.s32.totalorder %s383_s11, %s383_s11 }
  0x7d   : > { %p1603_p0 = scmp.ne.s32.totalorder %s383_s11, %s1602_s12  ;;  %p1611_p9 = scmp.lt.s32.totalorder %s1602_s12, %s1602_s12 }
  0x7f   : > { %p1605_p2 = pnand %p1603_p0, %p1945_p8  ;;  %p1612_p5 = por %p1611_p9, %p1610_p7 }
  0x81   : > { %p1606_p4 = pneg %p1605_p2 }
  0x83   : > { %p1613_p10 = pnand %p1612_p5, %p1606_p4 }
  0x85   : > { %1616 = shalt.err (!%p1613_p10)
}
  0x86   : > { %1419 = dma.hbm_to_vmem [thread:$0]  (!%p1929_p6), %s2338_s5, 512, %s383_s11, [#allocation14], %s1812_s14, %s1812_s14, %s1813_s15  }
  0x87   : > { %s1244_s10 = sadd.s32 4294967294, %s1807_s22   ;;  %s48_s27 = sadd.s32 1, %s1803_s21 }
  0x88   : > { %p50_p8 = scmp.ge.s32.totalorder %s48_s27, 2  ;;  %s55_s9 = sadd.s32 1, %s1795_s19 }
  0x89   : > { %p62_p1 = scmp.ne.s32.totalorder %s1795_s19, %s1791_s18  ;;  %p63_p3 = scmp.eq.s32.totalorder %s1807_s22, 0 }
  0x8a   : > { %s2370_s27 = smov (%p50_p8, %s48_s27), 0  ;;  %p68_p12 = scmp.ne.s32.totalorder %s1791_s18, %s1787_s17 }
  0x8b   : > { %2339 = sst [smem:[#allocation26_spill]] %s2370_s27  ;;  %p2046_p11 = por %p63_p3, %p62_p1 }
  0x8c   : > { %s52_s14 = ssub.s32 %s1803_s21, %s2370_s27  ;;  %p290_p6 = scmp.eq.s32.totalorder %s1913_s23, 1 }
  0x8d   : > { %p53_p13 = scmp.eq.s32.totalorder %s52_s14, 0  ;;  %p2341_p0 = scmp.eq.s32.totalorder %s1913_s23, 0 }
  0x8e   : > { %p2061_p4 = por %p290_p6, %p62_p1  ;;  %p296_p7 = scmp.eq.s32.totalorder %s1244_s10, 1 }
  0x8f   : > { %p2057_p2 = por %p2341_p0, %p68_p12  ;;  %p1438_p5 = scmp.lt.s32.totalorder %s1807_s22, 2 }
  0x90   : > { %s2343_s11 = scalar_select %p2061_p4, 1, 0 }
  0x91   : > { %s2342_s15 = scalar_select %p2057_p2, 1, 0 }
  0x92   : > { %s2066_s16 = scalar_select %p53_p13, %s1795_s19, %s55_s9  }
  0x93   : > { %p2068_p9 = por %p296_p7, %p68_p12  ;;  %s408_s28 = sand.u32 1, %s1795_s19  }
  0x94   : > { %s1252_s30 = sshll.u32 %s1803_s21, 7  ;;  %s2075_s13 = sshll.u32 %s408_s28, 3 }
  0x95   : > { %s2344_s25 = scalar_select %p2068_p9, 1, 0 }
  0x96   : > { %s2080_s29 = scalar_lea.hbm %s2303_s0, %s1252_s30  ;;  %s412_s8 = scalar_lea.vmem [#allocation4], %s2075_s13 }
  0x97   : > { %s419_s10 = sshll.u32 %s412_s8, 4  ;;  %p2085_p10 = pnand %p1438_p5, %p2046_p11  ;;  %s2089_s10 = int_to_ptr.vmem [resolvable:$true] %s419_s10 }
  0x98   : > { %s2094_s12 = scalar_lea.hbm %s2304_s1, %s1252_s30  ;;  %s409_s2 = scalar_lea.sflag [#allocation5], %s408_s28 }
  0x99   : > { %s1617_s3 = scalar_lea.hbm %s2080_s29, 128  ;;  %p1619_p1 = pneg %p2085_p10 }
  0x9a   : > { %p1618_p8 = scmp.ne.s32.totalorder %s2080_s29, %s1617_s3  ;;  %s1622_s4 = scalar_lea.hbm %s2303_s0, 256 }
  0x9b   : > { %p1623_p12 = scmp.lt.u32.totalorder %s2080_s29, %s2303_s0  ;;  %p1624_p6 = scmp.lt.u32.totalorder %s1622_s4, %s1617_s3 }
  0x9c   : > { %p1620_p3 = pnand %p1619_p1, %p1618_p8  ;;  %p1626_p0 = scmp.lt.u32.totalorder %s1617_s3, %s2080_s29 }
  0x9d   : > { %p1625_p13 = por %p1624_p6, %p1623_p12 }
  0x9e   : > { %p1621_p11 = pneg %p1620_p3 }
  0x9f   : > { %p1627_p7 = por %p1626_p0, %p1625_p13 }
  0xa1   : > { %p1628_p5 = pnand %p1627_p7, %p1621_p11 }
  0xa3   : > { %1631 = shalt.err (!%p1628_p5)
}
  0xa4   : > { %s1632_s28 = scalar_lea.vmem %s2089_s10, 128  ;;  %s1815_s30 = smov [#allocation4]  }
  0xa5   : > { %p1633_p8 = scmp.ne.s32.totalorder %s2089_s10, %s1632_s28  ;;  %s1637_s14 = sshll.u32 %s1815_s30, 4  ;;  %s1638_s14 = int_to_ptr.vmem [resolvable:$false] %s1637_s14 }
  0xa6   : > { %s1639_s5 = scalar_lea.vmem %s1638_s14, 256  ;;  %p1640_p4 = scmp.lt.s32.totalorder %s2089_s10, %s1638_s14 }
  0xa7   : > { %p1635_p3 = pnand %p1633_p8, %p1619_p1  ;;  %p1641_p12 = scmp.lt.s32.totalorder %s1639_s5, %s1632_s28 }
  0xa9   : > { %p1636_p9 = pneg %p1635_p3  ;;  %p1642_p6 = por %p1641_p12, %p1640_p4 }
  0xab   : > { %p1643_p13 = pnand %p1642_p6, %p1636_p9 }
  0xad   : > { %1646 = shalt.err (!%p1643_p13)
}
  0xae   : > { %1423 = dma.hbm_to_vmem [thread:$0]  (!%p2085_p10), %s2080_s29, 128, %s2089_s10, %s409_s2  }
  0xaf   : > { %s426_s3 = sand.u32 1, %s1807_s22   ;;  %s430_s4 = scalar_lea.vmem [#allocation7], %s2075_s13 }
  0xb0   : > { %s438_s27 = sshll.u32 %s430_s4, 4  ;;  %s427_s26 = scalar_lea.sflag [#allocation8], %s426_s3  ;;  %s439_s27 = int_to_ptr.vmem [resolvable:$true] %s438_s27 }
  0xb1   : > { %s1647_s20 = scalar_lea.hbm %s2094_s12, 128  ;;  %s1652_s30 = scalar_lea.hbm %s2304_s1, 256 }
  0xb2   : > { %p1648_p4 = scmp.ne.s32.totalorder %s2094_s12, %s1647_s20  ;;  %p1653_p0 = scmp.lt.u32.totalorder %s2094_s12, %s2304_s1 }
  0xb3   : > { %p1654_p7 = scmp.lt.u32.totalorder %s1652_s30, %s1647_s20  ;;  %p1656_p8 = scmp.lt.u32.totalorder %s1647_s20, %s2094_s12 }
  0xb4   : > { %p1650_p9 = pnand %p1648_p4, %p1619_p1 }
  0xb5   : > { %p1655_p5 = por %p1654_p7, %p1653_p0 }
  0xb6   : > { %p1651_p11 = pneg %p1650_p9 }
  0xb7   : > { %p1657_p3 = por %p1656_p8, %p1655_p5 }
  0xb9   : > { %p1658_p12 = pnand %p1657_p3, %p1651_p11 }
  0xbb   : > { %1661 = shalt.err (!%p1658_p12)
}
  0xbc   : > { %s1662_s2 = scalar_lea.vmem %s439_s27, 128  ;;  %s1816_s13 = smov [#allocation7]  }
  0xbd   : > { %p1663_p6 = scmp.ne.s32.totalorder %s439_s27, %s1662_s2  ;;  %s1667_s29 = sshll.u32 %s1816_s13, 4  ;;  %s1668_s29 = int_to_ptr.vmem [resolvable:$false] %s1667_s29 }
  0xbe   : > { %s1669_s10 = scalar_lea.vmem %s1668_s29, 256  ;;  %p1670_p9 = scmp.lt.s32.totalorder %s439_s27, %s1668_s29 }
  0xbf   : > { %p1665_p13 = pnand %p1663_p6, %p1619_p1  ;;  %p1671_p2 = scmp.lt.s32.totalorder %s1669_s10, %s1662_s2 }
  0xc1   : > { %p1666_p4 = pneg %p1665_p13  ;;  %p1672_p0 = por %p1671_p2, %p1670_p9 }
  0xc3   : > { %p1673_p7 = pnand %p1672_p0, %p1666_p4 }
  0xc5   : > { %1676 = shalt.err (!%p1673_p7)
}
  0xc6   : > { %1426 = dma.hbm_to_vmem [thread:$0]  (!%p2085_p10), %s2094_s12, 128, %s439_s27, %s427_s26  }
  0xc7   : > { %p2346_p11 = scmp.ne.s32.totalorder %s2332_s24, 0 }
  0xc8   : > { %s2145_s3 = sand.u32 (!%p2346_p11), 1, %s1791_s18   ;;  %p2347_p2 = scmp.ne.s32.totalorder (!%p2346_p11), %s2342_s15, 0 }
  0xc9   : > { %447 = sbr.rel (%p2346_p11) target bundleno = 1424 (0x590), region = 60  ;;  %s2148_s4 = sshll.u32 (!%p2346_p11), %s2145_s3, 3 }
  0xca   : > { %s450_s20 = scalar_lea.sflag (!%p2346_p11), [#allocation5], %s2145_s3  ;;  %s453_s8 = scalar_lea.vmem (!%p2346_p11), [#allocation4], %s2148_s4 }
  0xd0   : > { %1758 = dma.done.wait (%p2347_p2), %s450_s20, 128  }
  0xd1   : > { %1760 = vsyncadd (%p2347_p2), %s450_s20, 4294967168  ;;  %s458_s24 = sand.u32 1, %s1913_s23   ;;  %s462_s12 = scalar_lea.vmem [#allocation7], %s2148_s4 }
  0xd2   : > { %s459_s9 = scalar_lea.sflag [#allocation8], %s458_s24 }
  0xd3   : > { %1762 = dma.done.wait (%p2347_p2), %s459_s9, 128  }
  0xd4   : > { %1764 = vsyncadd (%p2347_p2), %s459_s9, 4294967168  ;;  %p2348_p10 = scmp.eq.s32.totalorder %s1913_s23, 0 }
  0xd6   : > { %1766 = dma.done.wait (%p2348_p10), [#allocation8], 512   ;;  %p2349_p1 = pmov %p2348_p10 }
  0xd8   : > { %1768 = vsyncadd (%p2349_p1), [#allocation8], 4294966784  ;;  %p2350_p5 = pmov %p2349_p1 }
  0xd9   : > { %p2351_p8 = pmov %p2349_p1 }
  0xda   : > { %1770 = dma.done.wait (%p2350_p5), [#allocation11], 1024  }
  0xdb   : > { %1772 = vsyncadd (%p2351_p8), [#allocation11], 4294966272  ;;  %p2352_p3 = pmov %p2349_p1 }
  0xdc   : > { %p2353_p12 = pmov %p2349_p1 }
  0xdd   : > { %1774 = dma.done.wait (%p2352_p3), [#allocation14], 512  }
  0xde   : > { %1776 = vsyncadd (%p2353_p12), [#allocation14], 4294966784  ;;  %v1817_v0 = vmov 0.0|0.0   ;;  %vm1818_vm0 = vmmov 0   ;;  %v1819_v1 = vmov 0.0   ;;  %v532_v2 = vld [vmem:[#allocation10] sm:$0xff] }
  0xdf   : > { %1359 = vmatprep.subr.bf16.mxu0 %v1817_v0  ;;  %1313 = vmatprep.mubr.msk.f32.mxu0 %vm1818_vm0, %v1819_v1  ;;  %v533_v3 = vld [vmem:[#allocation10 + $0x8] sm:$0xff]  ;;  %v534_v4 = vld [vmem:[#allocation10 + $0x10] sm:$0xff]  ;;  %v535_v6 = vld [vmem:[#allocation10 + $0x18] sm:$0xff]  ;;  %vm543_vm1 = vcmask 261120   ;;  %s2354_s14 = sld [smem:[#allocation31_spill]]  ;;  %vm863_vm2 = vcmask 64512  }
  0xe0   : > { %1365 = vmatprep.subr.bf16.mxu1 %v1817_v0  ;;  %1324 = vmatprep.mubr.msk.f32.mxu1 %vm1818_vm0, %v1819_v1  ;;  %v1360_v5 = vpack.c.bf16 %v533_v3, %v532_v2  ;;  %v1363_v7 = vpack.c.bf16 %v535_v6, %v534_v4  ;;  %v617_v8 = vld [vmem:[#allocation12] sm:$0xff]  ;;  %v618_v9 = vld [vmem:[#allocation12 + $0x8] sm:$0xff]  ;;  %v703_v15 = vld [vmem:[#allocation9 + $0x10] sm:$0xff]  ;;  %s526_s5 = scalar_lea.vmem [#allocation16], %s2148_s4  ;;  %s2355_s2 = sld [smem:[#allocation25_spill]] }
  0xe1   : > { %v701_v10 = vld [vmem:[#allocation9] sm:$0xff]  ;;  %v702_v11 = vld [vmem:[#allocation9 + $0x8] sm:$0xff]  ;;  %v1366_v12 = vpack.c.bf16 %v618_v9, %v617_v8  ;;  %v704_v16 = vld [vmem:[#allocation9 + $0x18] sm:$0xff]  ;;  %s2356_s20 = sld [smem:[#allocation34_spill]]  ;;  %s1069_s9 = sshll.u32 %s526_s5, 4  ;;  %s1070_s9 = int_to_ptr.vmem [resolvable:$true] %s1069_s9 }
  0xe2   : > { %1361 = vmatpush3.bf16.msra.mxu0 %v1360_v5  ;;  %v531_v13 = vld [vmem:[%s453_s8] sm:$0xff]  ;;  %v1372_v14 = vpack.c.bf16 %v702_v11, %v701_v10  ;;  %v1375_v17 = vpack.c.bf16 %v704_v16, %v703_v15  ;;  %v700_v18 = vld [vmem:[%s462_s12] sm:$0xff]  ;;  %s1041_s12 = scalar_lea.sflag [#allocation17], %s2145_s3  ;;  %s1677_s23 = scalar_lea.vmem %s1070_s9, 128 }
  0xe3   : > { %1362 = vmatprep.subr.bf16.mxu0 %v1817_v0  ;;  %1367 = vmatpush3.bf16.msra.mxu1 %v1366_v12  ;;  %v619_v19 = vld [vmem:[#allocation12 + $0x10] sm:$0xff]  ;;  %v620_v20 = vld [vmem:[#allocation12 + $0x18] sm:$0xff]  ;;  %v950_v44 = vld [vmem:[#allocation13] sm:$0xff]  ;;  %p1678_p6 = scmp.ne.s32.totalorder %s1070_s9, %s1677_s23  ;;  %p2358_p13 = scmp.ne.s32.totalorder %s2343_s11, 0 }
  0xe4   : > { %1368 = vmatprep.subr.bf16.mxu1 %v1817_v0  ;;  %v1369_v21 = vpack.c.bf16 %v620_v20, %v619_v19  ;;  %v1264_v22 = vld [vmem:[%s2310_s7] ss:$0 sm:$0xff]  ;;  %v951_v45 = vld [vmem:[#allocation13 + $0x8] sm:$0xff]  ;;  %v953_v48 = vld [vmem:[#allocation13 + $0x18] sm:$0xff]  ;;  %s1820_s15 = smov [#allocation16]  }
  0xe5   : > { %v1268_v26 = vld [vmem:[%s2309_s6] ss:$0 sm:$0xff]  ;;  %v1378_v47 = vpack.c.bf16 %v951_v45, %v950_v44  ;;  %p1679_p4 = pnand %p1678_p6, %p2358_p13  ;;  %s1681_s27 = sshll.u32 %s1820_s15, 4  ;;  %s1682_s27 = int_to_ptr.vmem [resolvable:$false] %s1681_s27 }
  0xe6   : > { %1364 = vmatpush3.bf16.msra.mxu0 %v1363_v7  ;;  %v1266_v31 = vld [vmem:[%s2354_s14] ss:$0 sm:$0xff]  ;;  %s1277_s13 = sshll.u32 %s2355_s2, 7  ;;  %s1683_s26 = scalar_lea.vmem %s1682_s27, 256 }
  0xe7   : > { %1371 = vmatprep.subr.bf16.mxu0 %v1817_v0  ;;  %1370 = vmatpush3.bf16.msra.mxu1 %v1369_v21  ;;  %v952_v46 = vld [vmem:[#allocation13 + $0x10] sm:$0xff]  ;;  %s2357_s8 = smov %s2356_s20  ;;  %s2222_s24 = scalar_lea.hbm %s2356_s20, %s1277_s13 }
  0xe8   : > { %1338 = vmatprep.subr.mxu1 %v1819_v1  ;;  %v1381_v49 = vpack.c.bf16 %v953_v48, %v952_v46  ;;  %p1680_p9 = pneg %p1679_p4  ;;  %p1684_p0 = scmp.lt.s32.totalorder %s1070_s9, %s1682_s27 }
  0xe9   : > { %1314 = vmatmul.mubr.msk.f32.vlgmr.msra.gmra.mrb[0].mxu0 %vm543_vm1, %v531_v13  ;;  %p1685_p7 = scmp.lt.s32.totalorder %s1683_s26, %s1677_s23 }
  0xea   : > { %1373 = vmatpush3.bf16.msra.mxu0 %v1372_v14  ;;  %1335 = vmatprep.mubr.msk.f32.mxu0 %vm1818_vm0, %v1819_v1 }
  0xeb   : > { %1374 = vmatprep.subr.bf16.mxu0 %v1817_v0  ;;  %1325 = vmatmul.mubr.msk.f32.vlgmr.msra.gmra.mrb[0].mxu1 %vm543_vm1, %v531_v13  ;;  %p1686_p11 = por %p1685_p7, %p1684_p0 }
  0xec   : > { %1340 = vmatprep.mubr.msk.f32.mxu1 %vm1818_vm0, %v1819_v1 }
  0xed   : > { %p1687_p2 = pnand %p1686_p11, %p1680_p9 }
  0xee   : > { %1376 = vmatpush3.bf16.msra.mxu0 %v1375_v17 }
  0xef   : > { %1377 = vmatprep.subr.bf16.mxu0 %v1817_v0 }
  0xf1   : > { %1336 = vmatmul.mubr.msk.f32.vlgmr.msra.gmra.mrb[2].mxu0 %vm543_vm1, %v700_v18 }
  0xf2   : > { %1356 = vmatprep.mubr.msk.f32.mxu0 %vm1818_vm0, %v1819_v1  ;;  %1379 = vmatpush3.bf16.msra.mxu0 %v1378_v47 }
  0xf3   : > { %1380 = vmatprep.subr.bf16.mxu0 %v1817_v0 }
  0xf6   : > { %1382 = vmatpush3.bf16.msra.mxu0 %v1381_v49 }
 0x1bc   : > { %v613_v23 = vpop.f32.mrb[0].mxu0 }
 0x1bd   : > { %v614_v24 = vadd.f32 %v1264_v22, %v613_v23  ;;  %v1315_v25 = vpop.f32.mrb[1].mxu0 }
 0x1be   : > { %v694_v32 = vpop.f32.mrb[0].mxu1 }
 0x1bf   : > { %698 = vst.msk [vmem:[#allocation2] sm:$0xff] %vm543_vm1, %v614_v24  ;;  %v695_v33 = vadd.f32 %v1266_v31, %v694_v32  ;;  %v1326_v34 = vpop.f32.mrb[1].mxu1 }
 0x1c1   : > { %699 = vst.msk [vmem:[#allocation3] sm:$0xff] %vm543_vm1, %v695_v33 }
 0x1c4   : > { %v782_v27 = vpop.f32.mrb[2].mxu0 }
 0x1c5   : > { %v1337_v28 = vpop.f32.mrb[3].mxu0  ;;  %v783_v29 = vadd.f32 %v1268_v26, %v782_v27 }
 0x1c6   : > { %v786_v30 = vld [vmem:[#allocation2] sm:$0xff] }
 0x1c7   : > { %1339 = vmatpush3.xpose.msk.msra.mxu1 %vm543_vm1, %v786_v30 }
 0x1c8   : > { %1343 = vmatprep.subr.mxu1 %v1819_v1  ;;  %v876_v35 = vld [vmem:[#allocation3] sm:$0xff] }
 0x1ca   : > { %1341 = vmatmul.mubr.msk.f32.vlgmr.msra.gmra.mrb[2].mxu1 %vm543_vm1, %v783_v29 }
 0x1cb   : > { %1345 = vmatprep.mubr.msk.f32.mxu1 %vm1818_vm0, %v1819_v1  ;;  %1344 = vmatpush3.msra.mxu1 %v876_v35 }
 0x29d   : > { %v859_v36 = vpop.f32.mrb[2].mxu1 }
 0x29e   : > { %864 = vst.msk [vmem:[%s526_s5] sm:$0xff] %vm863_vm2, %v859_v36  ;;  %v1342_v37 = vpop.f32.mrb[3].mxu1  ;;  %v865_v38 = vsel %vm863_vm2, %v859_v36, -inf }
 0x29f   : > { %866 = vmax.xlane.f32.xlu0 %v865_v38 }
 0x32c   : > { %v867_v39 = vpop.xlane.xlu0 %866 }
 0x32d   : > { %v868_v40 = vsub.f32 %v859_v36, %v867_v39 }
 0x32f   : > { %v869_v41 = vmul.f32 1.442695, %v868_v40 }
 0x331   : > { %1501 = vpow2.f32 %v869_v41 }
 0x33b   : > { %v1502_v42 = vpop.eup %1501 }
 0x33c   : > { %v871_v43 = vsel %vm863_vm2, %v1502_v42, 0.0 }
 0x33d   : > { %872 = vadd.xlane.f32.xlu0 %v871_v43 }
 0x3ca   : > { %v873_v50 = vpop.xlane.xlu0 %872 }
 0x3cb   : > { %1503 = vrcp.f32 %v873_v50 }
 0x3d5   : > { %v1504_v51 = vpop.eup %1503 }
 0x3d6   : > { %v875_v52 = vmul.f32 %v1504_v51, %v1502_v42 }
 0x3d8   : > { %1346 = vmatmul.mubr.msk.f32.vlgmr.msra.gmra.mrb[4].mxu1 %vm863_vm2, %v875_v52 }
 0x4ab   : > { %v946_v53 = vpop.f32.mrb[4].mxu1 }
 0x4ac   : > { %v1347_v54 = vpop.f32.mrb[5].mxu1  ;;  %1357 = vmatmul.mubr.msk.f32.vlgmr.msra.gmra.mrb[4].mxu0 %vm543_vm1, %v946_v53 }
 0x4ad   : > { %1690 = shalt.err (!%p1687_p2)
}
 0x4ae   : > { %s1691_s28 = scalar_lea.hbm %s2222_s24, 128  ;;  %s1695_s5 = scalar_lea.hbm %s2357_s8, 256 }
 0x4af   : > { %p1692_p10 = scmp.ne.s32.totalorder %s2222_s24, %s1691_s28  ;;  %p1696_p8 = scmp.lt.u32.totalorder %s2222_s24, %s2357_s8 }
 0x4b0   : > { %p1697_p3 = scmp.lt.u32.totalorder %s1695_s5, %s1691_s28  ;;  %p1699_p6 = scmp.lt.u32.totalorder %s1691_s28, %s2222_s24 }
 0x4b1   : > { %p1693_p1 = pnand %p1692_p10, %p2358_p13 }
 0x4b2   : > { %p1698_p12 = por %p1697_p3, %p1696_p8 }
 0x4b3   : > { %p1694_p5 = pneg %p1693_p1 }
 0x4b4   : > { %p1700_p4 = por %p1699_p6, %p1698_p12 }
 0x4b6   : > { %p1701_p9 = pnand %p1700_p4, %p1694_p5 }
 0x4b8   : > { %1704 = shalt.err (!%p1701_p9)
}
 0x4b9   : > { %1404 = dma.vmem_to_hbm [thread:$0]  (%p2358_p13), %s1070_s9, 128, %s2222_s24, %s1041_s12  }
 0x4ba   : > { %s2359_s15 = sld [smem:[#allocation32_spill]]  ;;  %s519_s27 = scalar_lea.vmem [#allocation15], %s2148_s4 }
 0x4bb   : > { %s1055_s26 = sshll.u32 %s519_s27, 4  ;;  %s2360_s14 = sld [smem:[#allocation33_spill]]  ;;  %s2255_s26 = int_to_ptr.vmem [resolvable:$true] %s1055_s26 }
 0x4bc   : > { %s1036_s24 = scalar_lea.sflag [#allocation6], %s2145_s3  ;;  %s1705_s9 = scalar_lea.vmem %s2255_s26, 128 }
 0x4bd   : > { %p1706_p0 = scmp.ne.s32.totalorder %s2255_s26, %s1705_s9  ;;  %s1821_s4 = smov [#allocation15]  }
 0x4be   : > { %s1709_s2 = sshll.u32 %s1821_s4, 4  ;;  %s1710_s2 = int_to_ptr.vmem [resolvable:$false] %s1709_s2 }
 0x4bf   : > { %p1707_p7 = pnand %p1706_p0, %p2358_p13  ;;  %s1711_s12 = scalar_lea.vmem %s1710_s2, 256 }
 0x4c0   : > { %v1273_v55 = vld [vmem:[%s2359_s15] ss:$0 sm:$0xff]  ;;  %p1712_p2 = scmp.lt.s32.totalorder %s2255_s26, %s1710_s2  ;;  %p1713_p10 = scmp.lt.s32.totalorder %s1711_s12, %s1705_s9 }
 0x4c1   : > { %s2253_s5 = scalar_lea.hbm %s2360_s14, %s1277_s13  ;;  %p1708_p11 = pneg %p1707_p7 }
 0x4c2   : > { %p1714_p1 = por %p1713_p10, %p1712_p2 }
 0x4c4   : > { %p1715_p5 = pnand %p1714_p1, %p1708_p11 }
 0x57f   : > { %v1030_v56 = vpop.f32.mrb[4].mxu0 }
 0x580   : > { %v1031_v57 = vadd.f32 %v1273_v55, %v1030_v56  ;;  %v1358_v58 = vpop.f32.mrb[5].mxu0 }
 0x582   : > { %1034 = vst.msk [vmem:[%s519_s27] sm:$0xff] %vm543_vm1, %v1031_v57 }
 0x583   : > { %1718 = shalt.err (!%p1715_p5)
}
 0x584   : > { %s1719_s3 = scalar_lea.hbm %s2253_s5, 128  ;;  %s1723_s10 = scalar_lea.hbm %s2360_s14, 256 }
 0x585   : > { %p1720_p8 = scmp.ne.s32.totalorder %s2253_s5, %s1719_s3  ;;  %p1724_p6 = scmp.lt.u32.totalorder %s2253_s5, %s2360_s14 }
 0x586   : > { %p1725_p4 = scmp.lt.u32.totalorder %s1723_s10, %s1719_s3  ;;  %p1727_p0 = scmp.lt.u32.totalorder %s1719_s3, %s2253_s5 }
 0x587   : > { %p1721_p3 = pnand %p1720_p8, %p2358_p13 }
 0x588   : > { %p1726_p9 = por %p1725_p4, %p1724_p6 }
 0x589   : > { %p1722_p12 = pneg %p1721_p3 }
 0x58a   : > { %p1728_p7 = por %p1727_p0, %p1726_p9 }
 0x58c   : > { %p1729_p11 = pnand %p1728_p7, %p1722_p12 }
 0x58e   : > { %1732 = shalt.err (!%p1729_p11)
}
 0x58f   : > { %1403 = dma.vmem_to_hbm [thread:$0]  (%p2358_p13), %s2255_s26, 128, %s2253_s5, %s1036_s24  }
 0x590 PF: > { %s1081_s15 = sand.u32 1, %s1787_s17   ;;  %p2361_p2 = scmp.ne.s32.totalorder %s2344_s25, 0 }
 0x591   : > { %p2362_p10 = scmp.ge.s32.totalorder %s1807_s22, 2  ;;  %s1082_s27 = scalar_lea.sflag [#allocation6], %s1081_s15 }
 0x593   : > { %p1428_p1 = pnand %p2362_p10, %p2361_p2 }
 0x595   : > { %1778 = dma.done.wait (!%p1428_p1), %s1082_s27, 128  }
 0x596   : > { %1780 = vsyncadd (!%p1428_p1), %s1082_s27, 4294967168  ;;  %s1091_s28 = scalar_lea.sflag [#allocation17], %s1081_s15 }
 0x597   : > { %1782 = dma.done.wait (!%p1428_p1), %s1091_s28, 128  }
 0x598   : > { %1784 = vsyncadd (!%p1428_p1), %s1091_s28, 4294967168  ;;  %s36_s22 = sadd.s32 1, %s1807_s22   ;;  %s2363_s11 = sld [smem:[#allocation26_spill]] }
 0x599   : > { %p33_p5 = scmp.ge.s32.totalorder %s36_s22, 4   ;;  %s2364_s17 = smov %s1791_s18 }
 0x59a   : > { %s2365_s18 = smov %s1795_s19  ;;  %s2366_s19 = smov %s2066_s16 }
 0x59b   : > { %s2367_s20 = smov %s1803_s21  ;;  %35 = sbr.rel (!%p33_p5) target bundleno = 21 (0x15), region = 155 }
 0x59e   : > { %s2368_s21 = smov %s2363_s11 }
 0x5a2   :  { %1096 = vsyncpa [#allocation5], 1 }
 0x5a3   :  { %1098 = vsyncpa [#allocation5 + $0x1], 1 }
 0x5a4   :  { %1099 = vsyncpa [#allocation8], 1 }
 0x5a5   :  { %1101 = vsyncpa [#allocation8 + $0x1], 1 }
 0x5a6   :  { %1102 = vsyncpa [#allocation11], 1 }
 0x5a7   :  { %1103 = vsyncpa [#allocation14], 1 }
 0x5a8   :  { %1104 = vsyncpa [#allocation6], 1 }
 0x5a9   :  { %1106 = vsyncpa [#allocation6 + $0x1], 1 }
 0x5aa   :  { %1107 = vsyncpa [#allocation17], 1 }
 0x5ab   :  { %1109 = vsyncpa [#allocation17 + $0x1], 1 }

</bundles_post_ra>
